<compile_context>
chip_gen: v7x
topology: tpu7x:2x2x1
jax: 0.10.0
libtpu: 0.0.40
codegen_flags: <defaults>
</compile_context>

<pallas_src>
import numpy as np
import jax
import jax.numpy as jnp
from jax.experimental import pallas as pl
from jax.experimental.pallas import tpu as pltpu


# --------------------------------------------------------------------------------------
# Pallas kernel (one grid step = B samples)
# --------------------------------------------------------------------------------------
def make_skeleton_residual_forward(N, B, D_in, D_mid, D_y, D_out, G, BW, eps=1e-5):
    assert N % B == 0, "batch must be divisible by the per-step block size"
    grid = (N // B,)

    def kernel(x_ref, w1_ref, w2_ref, bias_ref, m_grp_ref, m_back_ref,
               pg_ref, wsp_ref, alphas_ref, o_ref):
        x = x_ref[...]                                        # (B, D_in)
        a_e = alphas_ref[0]                                   # PReLU slope (extra conv)
        a_c = alphas_ref[1]                                   # PReLU slope (common)

        # ---- extra SkeletonConv (all taps + zero padding folded into one matmul) + PReLU ----
        h = jnp.dot(x, w1_ref[...], preferred_element_type=jnp.float32)
        h = h + bias_ref[0:1, :D_mid]
        h = jnp.where(h >= 0, h, a_e * h)

        # ---- main SkeletonConv (taps + stride-2 selection folded into one matmul) ----
        y = jnp.dot(h, w2_ref[...], preferred_element_type=jnp.float32)
        y = y + bias_ref[1:2, :D_y]

        # ---- GroupNorm(G): two-pass stats via group-indicator matmuls ----
        gmean = jnp.dot(y, m_grp_ref[...], preferred_element_type=jnp.float32)     # (B, G)
        mean_c = jnp.dot(gmean, m_back_ref[...], preferred_element_type=jnp.float32)
        d = y - mean_c
        gvar = jnp.dot(d * d, m_grp_ref[...], preferred_element_type=jnp.float32)  # (B, G)
        rstd = jax.lax.rsqrt(gvar + eps)                                            # (B, G)
        rstd_c = jnp.dot(rstd, m_back_ref[...], preferred_element_type=jnp.float32)
        y_norm = d * rstd_c

        # ---- (gamma ∘ pool) on residual  +  (shortcut conv ∘ pool) on x  +  pooled consts ----
        pooled = (jnp.dot(y_norm, pg_ref[...], preferred_element_type=jnp.float32)
                  + jnp.dot(x, wsp_ref[...], preferred_element_type=jnp.float32)
                  + bias_ref[2:3, :D_out])

        # ---- common PReLU ----
        o_ref[...] = jnp.where(pooled >= 0, pooled, a_c * pooled)

    grid_spec = pltpu.PrefetchScalarGridSpec(
        num_scalar_prefetch=0,
        grid=grid,
        in_specs=[
            pl.BlockSpec((B, D_in), lambda n: (n, 0)),        # x (flattened per-sample)
            pl.BlockSpec((D_in, D_mid), lambda n: (0, 0)),    # extra-conv big weight
            pl.BlockSpec((D_mid, D_y), lambda n: (0, 0)),     # main-conv big weight
            pl.BlockSpec((3, BW), lambda n: (0, 0)),          # bias slab [b_extra|b_res|const]
            pl.BlockSpec((D_y, G), lambda n: (0, 0)),         # column -> group (scaled 1/cnt)
            pl.BlockSpec((G, D_y), lambda n: (0, 0)),         # group -> column broadcast
            pl.BlockSpec((D_y, D_out), lambda n: (0, 0)),     # gamma ∘ pool (block-diag time)
            pl.BlockSpec((D_in, D_out), lambda n: (0, 0)),    # shortcut conv ∘ pool
            pl.BlockSpec(memory_space=pltpu.MemorySpace.SMEM),  # PReLU alphas (2,)
        ],
        out_specs=pl.BlockSpec((B, D_out), lambda n: (n, 0)),
    )

    return pl.pallas_call(
        kernel,
        out_shape=jax.ShapeDtypeStruct((N, D_out), jnp.float32),
        grid_spec=grid_spec,
        compiler_params=pltpu.CompilerParams(dimension_semantics=("parallel",)),
    )


# --------------------------------------------------------------------------------------
# Host-side folding helpers
# --------------------------------------------------------------------------------------
def conv_unroll(w_oik, T_in, T_out, stride, pad):
    """Fold a 1-D conv (OIH weight) over time into a dense (T_in*C_i, T_out*C_o) matrix."""
    C_o, C_i, K = w_oik.shape
    W = np.zeros((T_in * C_i, T_out * C_o), np.float32)
    for t in range(T_out):
        for k in range(K):
            s = stride * t + k - pad
            if 0 <= s < T_in:
                W[s * C_i:(s + 1) * C_i, t * C_o:(t + 1) * C_o] = w_oik[:, :, k].T
    return W


def skeleton_mask(neighbour_list, out_per_joint, in_per_joint):
    J = len(neighbour_list)
    m = np.zeros((J * out_per_joint, J * in_per_joint), np.float32)
    for j, nbs in enumerate(neighbour_list):
        for nb in nbs:
            m[j * out_per_joint:(j + 1) * out_per_joint,
              nb * in_per_joint:(nb + 1) * in_per_joint] = 1.0
    return m


# --------------------------------------------------------------------------------------
# Pure-JAX reference of the PyTorch forward (NCT layout), for verification
# --------------------------------------------------------------------------------------
def reference_forward(x_nct, p, stride, pad, groups, eps=1e-5):
    def conv1d(x, w, b, s, padding):
        y = jax.lax.conv_general_dilated(
            x, w, window_strides=(s,), padding=[(padding, padding)],
            dimension_numbers=("NCH", "OIH", "NCH"),
            precision=jax.lax.Precision.HIGHEST)
        return y + b[None, :, None]

    def prelu(v, a):
        return jnp.where(v >= 0, v, a * v)

    h = conv1d(x_nct, p["w_extra"], p["b_extra"], 1, pad)
    h = prelu(h, p["a_extra"])
    y = conv1d(h, p["w_res"], p["b_res"], stride, pad)
    Nb, C, Tt = y.shape
    yg = y.reshape(Nb, groups, C // groups, Tt)
    mean = yg.mean(axis=(2, 3), keepdims=True)
    var = yg.var(axis=(2, 3), keepdims=True)
    y = ((yg - mean) / jnp.sqrt(var + eps)).reshape(Nb, C, Tt)
    y = y * p["gamma"][None, :, None] + p["beta"][None, :, None]
    z = conv1d(x_nct, p["w_short"], p["b_short"], stride, 0)
    out = y + z
    pooled = jnp.einsum("pc,nct->npt", p["pool_w"], out,
                        precision=jax.lax.Precision.HIGHEST)
    return prelu(pooled, p["a_common"])


# --------------------------------------------------------------------------------------
# Driver
# --------------------------------------------------------------------------------------
if __name__ == "__main__":
    # ---- module hyper-parameters ----
    N, B, T = 32, 16, 8                              # batch, per-grid-step block, time
    joint_num = 4                                    # number of skeleton edges
    cpj_in, cpj_out = 4, 8
    C_in, C_out = joint_num * cpj_in, joint_num * cpj_out        # 16, 32
    K, STRIDE, PAD, GROUPS = 3, 2, 1, 8
    neighbour_list = [[0, 1], [0, 1, 2], [1, 2, 3], [2, 3]]      # chain skeleton
    pooling_list = [[0, 1], [2, 3]]                  # mean-pool merges consecutive edges
    cpe = C_out // joint_num
    C_pool = len(pooling_list) * cpe                              # 16
    T_OUT = (T + 2 * PAD - K) // STRIDE + 1                       # 4
    EPS = 1e-5

    D_in = T * C_in                                               # 128
    D_mid = T * C_in                                              # 128
    D_y = T_OUT * C_out                                           # 128
    D_out = T_OUT * C_pool                                        # 64
    BW = ((max(D_mid, D_y, D_out) + 127) // 128) * 128            # 128

    # ---- deterministic parameter init (masked skeleton convs) ----
    key = jax.random.PRNGKey(0)
    ks = jax.random.split(key, 10)
    mask_in = skeleton_mask(neighbour_list, cpj_in, cpj_in)       # (C_in, C_in)
    mask_out = skeleton_mask(neighbour_list, cpj_out, cpj_in)     # (C_out, C_in)

    w_extra = (0.1 * jax.random.normal(ks[0], (C_in, C_in, K), jnp.float32)
               * mask_in[..., None])
    b_extra = 0.1 * jax.random.normal(ks[1], (C_in,), jnp.float32)
    w_res = (0.1 * jax.random.normal(ks[2], (C_out, C_in, K), jnp.float32)
             * mask_out[..., None])
    b_res = 0.1 * jax.random.normal(ks[3], (C_out,), jnp.float32)
    gamma = 1.0 + 0.1 * jax.random.normal(ks[4], (C_out,), jnp.float32)
    beta = 0.1 * jax.random.normal(ks[5], (C_out,), jnp.float32)
    w_short = (0.1 * jax.random.normal(ks[6], (C_out, C_in, 1), jnp.float32)
               * mask_out[..., None])
    b_short = 0.1 * jax.random.normal(ks[7], (C_out,), jnp.float32)
    a_extra = jnp.float32(0.25)                      # PReLU init
    a_common = jnp.float32(0.25)

    pool_w = np.zeros((C_pool, C_out), np.float32)   # SkeletonPool 'mean' weight
    for i, pair in enumerate(pooling_list):
        for j in pair:
            for c in range(cpe):
                pool_w[i * cpe + c, j * cpe + c] = 1.0 / len(pair)

    # ---- input (PyTorch NCT view) ----
    x_nct = jax.random.normal(ks[8], (N, C_in, T), jnp.float32)

    # ---- host-side folding into big dense weights ----
    w_extra_np = np.asarray(w_extra)
    w_res_np = np.asarray(w_res)
    w_short_np = np.asarray(w_short)
    gamma_np, beta_np = np.asarray(gamma), np.asarray(beta)
    b_short_np = np.asarray(b_short)

    w1_big = conv_unroll(w_extra_np, T, T, 1, PAD)                       # (D_in, D_mid)
    w2_big = conv_unroll(w_res_np, T, T_OUT, STRIDE, PAD)                # (D_mid, D_y)

    ws_pool = w_short_np[:, :, 0].T @ pool_w.T                           # (C_in, C_pool)
    wsp_big = conv_unroll(ws_pool.T[:, :, None], T, T_OUT, STRIDE, 0)    # (D_in, D_out)

    gp = gamma_np[:, None] * pool_w.T                                    # (C_out, C_pool)
    pg_big = conv_unroll(gp.T[:, :, None], T_OUT, T_OUT, 1, 0)           # (D_y, D_out)

    bias_slab = np.zeros((3, BW), np.float32)
    bias_slab[0, :D_mid] = np.tile(np.asarray(b_extra), T)
    bias_slab[1, :D_y] = np.tile(np.asarray(b_res), T_OUT)
    const_row = (beta_np + b_short_np) @ pool_w.T                        # (C_pool,)
    bias_slab[2, :D_out] = np.tile(const_row, T_OUT)

    cpg = C_out // GROUPS
    m_grp = np.zeros((D_y, GROUPS), np.float32)                          # column -> group
    for j in range(D_y):
        g = (j % C_out) // cpg
        m_grp[j, g] = 1.0 / (T_OUT * cpg)
    m_back = (m_grp > 0).astype(np.float32).T                            # group -> column

    alphas = jnp.array([0.25, 0.25], jnp.float32)                        # [a_extra, a_common]

    # ---- flatten input per sample (time-major) ----
    x_flat = jnp.transpose(x_nct, (0, 2, 1)).reshape(N, D_in)            # (N, T*C_in)

    # ---- run fused kernel ----
    fwd = make_skeleton_residual_forward(N, B, D_in, D_mid, D_y, D_out, GROUPS, BW, EPS)
    out_flat = fwd(x_flat,
                   jnp.asarray(w1_big), jnp.asarray(w2_big), jnp.asarray(bias_slab),
                   jnp.asarray(m_grp), jnp.asarray(m_back),
                   jnp.asarray(pg_big), jnp.asarray(wsp_big),
                   alphas)
    out_flat = jax.block_until_ready(out_flat)
    out_nct = jnp.transpose(out_flat.reshape(N, T_OUT, C_pool), (0, 2, 1))  # PyTorch NCT

    # ---- verify against pure-JAX reference ----
    params = dict(w_extra=w_extra, b_extra=b_extra, a_extra=a_extra,
                  w_res=w_res, b_res=b_res, gamma=gamma, beta=beta,
                  w_short=w_short, b_short=b_short,
                  pool_w=jnp.asarray(pool_w), a_common=a_common)
    ref = reference_forward(x_nct, params, STRIDE, PAD, GROUPS, EPS)
    assert out_nct.shape == (N, C_pool, T_OUT), out_nct.shape
    np.testing.assert_allclose(np.asarray(out_nct), np.asarray(ref), rtol=2e-2, atol=2e-2)

    print("KERNEL_OK")
</pallas_src>

<mosaic_0001>
module attributes {stable_mosaic.version = 11 : i64} {
  func.func @kernel(%arg0: i32, %arg1: memref<16x128xf32, #tpu.memory_space<vmem>>, %arg2: memref<128x128xf32, #tpu.memory_space<vmem>>, %arg3: memref<128x128xf32, #tpu.memory_space<vmem>>, %arg4: memref<3x128xf32, #tpu.memory_space<vmem>>, %arg5: memref<128x8xf32, #tpu.memory_space<vmem>>, %arg6: memref<8x128xf32, #tpu.memory_space<vmem>>, %arg7: memref<128x64xf32, #tpu.memory_space<vmem>>, %arg8: memref<128x64xf32, #tpu.memory_space<vmem>>, %arg9: memref<2xf32, #tpu.memory_space<smem>>, %arg10: memref<16x64xf32, #tpu.memory_space<vmem>>) attributes {dimension_semantics = [#tpu.dimension_semantics<parallel>], iteration_bounds = array<i64: 2>, scalar_prefetch = 0 : i64, scratch_operands = 0 : i64, tpu.core_type = #tpu.core_type<tc>, window_params = [{transform_indices = @transform_0, window_bounds = array<i64: 16, 128>}, {pipeline_mode = #tpu.pipeline_mode<synchronous>, transform_indices = @transform_1, window_bounds = array<i64: 128, 128>}, {pipeline_mode = #tpu.pipeline_mode<synchronous>, transform_indices = @transform_2, window_bounds = array<i64: 128, 128>}, {pipeline_mode = #tpu.pipeline_mode<synchronous>, transform_indices = @transform_3, window_bounds = array<i64: 3, 128>}, {pipeline_mode = #tpu.pipeline_mode<synchronous>, transform_indices = @transform_4, window_bounds = array<i64: 128, 8>}, {pipeline_mode = #tpu.pipeline_mode<synchronous>, transform_indices = @transform_5, window_bounds = array<i64: 8, 128>}, {pipeline_mode = #tpu.pipeline_mode<synchronous>, transform_indices = @transform_6, window_bounds = array<i64: 128, 64>}, {pipeline_mode = #tpu.pipeline_mode<synchronous>, transform_indices = @transform_7, window_bounds = array<i64: 128, 64>}, {transform_indices = @transform_8, window_bounds = array<i64: 2>}, {transform_indices = @transform_9, window_bounds = array<i64: 16, 64>}]} {
    %c0 = arith.constant 0 : index
    %c0_0 = arith.constant 0 : index
    %0 = vector.load %arg1[%c0, %c0_0] : memref<16x128xf32, #tpu.memory_space<vmem>>, vector<16x128xf32>
    %c0_1 = arith.constant 0 : index
    %1 = memref.load %arg9[%c0_1] : memref<2xf32, #tpu.memory_space<smem>>
    %c1 = arith.constant 1 : index
    %2 = memref.load %arg9[%c1] : memref<2xf32, #tpu.memory_space<smem>>
    %c0_2 = arith.constant 0 : index
    %c0_3 = arith.constant 0 : index
    %3 = vector.load %arg2[%c0_2, %c0_3] : memref<128x128xf32, #tpu.memory_space<vmem>>, vector<128x128xf32>
    %cst = arith.constant dense<0.000000e+00> : vector<16x128xf32>
    %4 = tpu.matmul %0, %3, %cst {dimension_numbers = #tpu.dot_dimension_numbers<[1], [0], [0], [1], [0, 0, 1, 1], [], []>} : vector<16x128xf32>, vector<128x128xf32>, vector<16x128xf32> -> vector<16x128xf32>
    %c0_4 = arith.constant 0 : index
    %c0_5 = arith.constant 0 : index
    %5 = vector.load %arg4[%c0_4, %c0_5] : memref<3x128xf32, #tpu.memory_space<vmem>>, vector<1x128xf32>
    %6 = vector.broadcast %5 : vector<1x128xf32> to vector<16x128xf32>
    %7 = arith.addf %4, %6 : vector<16x128xf32>
    %cst_6 = arith.constant 0.000000e+00 : f32
    %8 = vector.broadcast %cst_6 : f32 to vector<16x128xf32>
    %9 = arith.cmpf oge, %7, %8 : vector<16x128xf32>
    %10 = vector.broadcast %1 : f32 to vector<16x128xf32>
    %11 = arith.mulf %10, %7 : vector<16x128xf32>
    %12 = arith.select %9, %7, %11 : vector<16x128xi1>, vector<16x128xf32>
    %c0_7 = arith.constant 0 : index
    %c0_8 = arith.constant 0 : index
    %13 = vector.load %arg3[%c0_7, %c0_8] : memref<128x128xf32, #tpu.memory_space<vmem>>, vector<128x128xf32>
    %cst_9 = arith.constant dense<0.000000e+00> : vector<16x128xf32>
    %14 = tpu.matmul %12, %13, %cst_9 {dimension_numbers = #tpu.dot_dimension_numbers<[1], [0], [0], [1], [0, 0, 1, 1], [], []>} : vector<16x128xf32>, vector<128x128xf32>, vector<16x128xf32> -> vector<16x128xf32>
    %c1_10 = arith.constant 1 : index
    %c0_11 = arith.constant 0 : index
    %15 = vector.load %arg4[%c1_10, %c0_11] : memref<3x128xf32, #tpu.memory_space<vmem>>, vector<1x128xf32>
    %16 = vector.broadcast %15 : vector<1x128xf32> to vector<16x128xf32>
    %17 = arith.addf %14, %16 : vector<16x128xf32>
    %c0_12 = arith.constant 0 : index
    %c0_13 = arith.constant 0 : index
    %18 = vector.load %arg5[%c0_12, %c0_13] : memref<128x8xf32, #tpu.memory_space<vmem>>, vector<128x8xf32>
    %cst_14 = arith.constant dense<0.000000e+00> : vector<16x8xf32>
    %19 = tpu.matmul %17, %18, %cst_14 {dimension_numbers = #tpu.dot_dimension_numbers<[1], [0], [0], [1], [0, 0, 1, 1], [], []>} : vector<16x128xf32>, vector<128x8xf32>, vector<16x8xf32> -> vector<16x8xf32>
    %c0_15 = arith.constant 0 : index
    %c0_16 = arith.constant 0 : index
    %20 = vector.load %arg6[%c0_15, %c0_16] : memref<8x128xf32, #tpu.memory_space<vmem>>, vector<8x128xf32>
    %cst_17 = arith.constant dense<0.000000e+00> : vector<16x128xf32>
    %21 = tpu.matmul %19, %20, %cst_17 {dimension_numbers = #tpu.dot_dimension_numbers<[1], [0], [0], [1], [0, 0, 1, 1], [], []>} : vector<16x8xf32>, vector<8x128xf32>, vector<16x128xf32> -> vector<16x128xf32>
    %22 = arith.subf %17, %21 : vector<16x128xf32>
    %23 = arith.mulf %22, %22 : vector<16x128xf32>
    %c0_18 = arith.constant 0 : index
    %c0_19 = arith.constant 0 : index
    %24 = vector.load %arg5[%c0_18, %c0_19] : memref<128x8xf32, #tpu.memory_space<vmem>>, vector<128x8xf32>
    %cst_20 = arith.constant dense<0.000000e+00> : vector<16x8xf32>
    %25 = tpu.matmul %23, %24, %cst_20 {dimension_numbers = #tpu.dot_dimension_numbers<[1], [0], [0], [1], [0, 0, 1, 1], [], []>} : vector<16x128xf32>, vector<128x8xf32>, vector<16x8xf32> -> vector<16x8xf32>
    %cst_21 = arith.constant 9.99999974E-6 : f32
    %26 = vector.broadcast %cst_21 : f32 to vector<16x8xf32>
    %27 = arith.addf %25, %26 : vector<16x8xf32>
    %28 = math.rsqrt %27 : vector<16x8xf32>
    %c0_22 = arith.constant 0 : index
    %c0_23 = arith.constant 0 : index
    %29 = vector.load %arg6[%c0_22, %c0_23] : memref<8x128xf32, #tpu.memory_space<vmem>>, vector<8x128xf32>
    %cst_24 = arith.constant dense<0.000000e+00> : vector<16x128xf32>
    %30 = tpu.matmul %28, %29, %cst_24 {dimension_numbers = #tpu.dot_dimension_numbers<[1], [0], [0], [1], [0, 0, 1, 1], [], []>} : vector<16x8xf32>, vector<8x128xf32>, vector<16x128xf32> -> vector<16x128xf32>
    %31 = arith.mulf %22, %30 : vector<16x128xf32>
    %c0_25 = arith.constant 0 : index
    %c0_26 = arith.constant 0 : index
    %32 = vector.load %arg7[%c0_25, %c0_26] : memref<128x64xf32, #tpu.memory_space<vmem>>, vector<128x64xf32>
    %cst_27 = arith.constant dense<0.000000e+00> : vector<16x64xf32>
    %33 = tpu.matmul %31, %32, %cst_27 {dimension_numbers = #tpu.dot_dimension_numbers<[1], [0], [0], [1], [0, 0, 1, 1], [], []>} : vector<16x128xf32>, vector<128x64xf32>, vector<16x64xf32> -> vector<16x64xf32>
    %c0_28 = arith.constant 0 : index
    %c0_29 = arith.constant 0 : index
    %34 = vector.load %arg8[%c0_28, %c0_29] : memref<128x64xf32, #tpu.memory_space<vmem>>, vector<128x64xf32>
    %cst_30 = arith.constant dense<0.000000e+00> : vector<16x64xf32>
    %35 = tpu.matmul %0, %34, %cst_30 {dimension_numbers = #tpu.dot_dimension_numbers<[1], [0], [0], [1], [0, 0, 1, 1], [], []>} : vector<16x128xf32>, vector<128x64xf32>, vector<16x64xf32> -> vector<16x64xf32>
    %36 = arith.addf %33, %35 : vector<16x64xf32>
    %c2 = arith.constant 2 : index
    %c0_31 = arith.constant 0 : index
    %37 = vector.load %arg4[%c2, %c0_31] : memref<3x128xf32, #tpu.memory_space<vmem>>, vector<1x64xf32>
    %38 = vector.broadcast %37 : vector<1x64xf32> to vector<16x64xf32>
    %39 = arith.addf %36, %38 : vector<16x64xf32>
    %cst_32 = arith.constant 0.000000e+00 : f32
    %40 = vector.broadcast %cst_32 : f32 to vector<16x64xf32>
    %41 = arith.cmpf oge, %39, %40 : vector<16x64xf32>
    %42 = vector.broadcast %2 : f32 to vector<16x64xf32>
    %43 = arith.mulf %42, %39 : vector<16x64xf32>
    %44 = arith.select %41, %39, %43 : vector<16x64xi1>, vector<16x64xf32>
    %c0_33 = arith.constant 0 : index
    %c0_34 = arith.constant 0 : index
    %45 = vector.load %arg10[%c0_33, %c0_34] : memref<16x64xf32, #tpu.memory_space<vmem>>, vector<16x64xf32>
    tpu.vector_store %arg10[%c0_33, %c0_34], %44 {strides = array<i32>} : memref<16x64xf32, #tpu.memory_space<vmem>>, vector<16x64xf32>,
    return
  }
  func.func @transform_0(%arg0: i32) -> (i32, i32) {
    %c0_i32 = arith.constant 0 : i32
    %c0_i32_0 = arith.constant 0 : i32
    return %arg0, %c0_i32 : i32, i32
  }
  func.func @transform_1(%arg0: i32) -> (i32, i32) {
    %c0_i32 = arith.constant 0 : i32
    %c0_i32_0 = arith.constant 0 : i32
    %c0_i32_1 = arith.constant 0 : i32
    return %c0_i32, %c0_i32_0 : i32, i32
  }
  func.func @transform_2(%arg0: i32) -> (i32, i32) {
    %c0_i32 = arith.constant 0 : i32
    %c0_i32_0 = arith.constant 0 : i32
    %c0_i32_1 = arith.constant 0 : i32
    return %c0_i32, %c0_i32_0 : i32, i32
  }
  func.func @transform_3(%arg0: i32) -> (i32, i32) {
    %c0_i32 = arith.constant 0 : i32
    %c0_i32_0 = arith.constant 0 : i32
    %c0_i32_1 = arith.constant 0 : i32
    return %c0_i32, %c0_i32_0 : i32, i32
  }
  func.func @transform_4(%arg0: i32) -> (i32, i32) {
    %c0_i32 = arith.constant 0 : i32
    %c0_i32_0 = arith.constant 0 : i32
    %c0_i32_1 = arith.constant 0 : i32
    return %c0_i32, %c0_i32_0 : i32, i32
  }
  func.func @transform_5(%arg0: i32) -> (i32, i32) {
    %c0_i32 = arith.constant 0 : i32
    %c0_i32_0 = arith.constant 0 : i32
    %c0_i32_1 = arith.constant 0 : i32
    return %c0_i32, %c0_i32_0 : i32, i32
  }
  func.func @transform_6(%arg0: i32) -> (i32, i32) {
    %c0_i32 = arith.constant 0 : i32
    %c0_i32_0 = arith.constant 0 : i32
    %c0_i32_1 = arith.constant 0 : i32
    return %c0_i32, %c0_i32_0 : i32, i32
  }
  func.func @transform_7(%arg0: i32) -> (i32, i32) {
    %c0_i32 = arith.constant 0 : i32
    %c0_i32_0 = arith.constant 0 : i32
    %c0_i32_1 = arith.constant 0 : i32
    return %c0_i32, %c0_i32_0 : i32, i32
  }
  func.func @transform_8(%arg0: i32) -> i32 {
    %c0_i32 = arith.constant 0 : i32
    %c0_i32_0 = arith.constant 0 : i32
    return %c0_i32 : i32
  }
  func.func @transform_9(%arg0: i32) -> (i32, i32) {
    %c0_i32 = arith.constant 0 : i32
    %c0_i32_0 = arith.constant 0 : i32
    return %arg0, %c0_i32 : i32, i32
  }
}

</mosaic_0001>

<bundles_post_ra>
// kernel: tpu_custom_call.1
= control target key start
LH: loop header
LB: loop body
LE: loop exit
PB: predicated region body
PF: predicated region fallthrough
CT: control target
= control target key end

     0   :  { %14 = vsyncpa [#allocation4], 0  ;;  %s2336_s0 = inlined_call_operand.vmem [shape: f32[32,128], index: 0, kind: input, shape index: {}]   ;;  %s2337_s1 = inlined_call_operand.vmem [shape: f32[128,128], index: 1, kind: input, shape index: {}]   ;;  %s2338_s2 = inlined_call_operand.vmem [shape: f32[128,128], index: 2, kind: input, shape index: {}]   ;;  %s2339_s3 = inlined_call_operand.vmem [shape: f32[3,128], index: 3, kind: input, shape index: {}]   ;;  %s2340_s4 = inlined_call_operand.vmem [shape: f32[128,8], index: 4, kind: input, shape index: {}]   ;;  %s2341_s5 = inlined_call_operand.vmem [shape: f32[8,128], index: 5, kind: input, shape index: {}]   ;;  %s2342_s6 = inlined_call_operand.vmem [shape: f32[128,64], index: 6, kind: input, shape index: {}]   ;;  %s2343_s7 = inlined_call_operand.vmem [shape: f32[128,64], index: 7, kind: input, shape index: {}]   ;;  %s2344_s8 = inlined_call_operand.vmem [shape: f32[2], index: 8, kind: input, shape index: {}]   ;;  %s2345_s9 = inlined_call_operand.hbm [shape: f32[32,64], index: 9, kind: output, shape index: {}]  }
   0x1   :  { %15 = vsyncpa [#allocation3], 0 }
   0x2   :  { %17 = vsyncpa [#allocation3 + $0x1], 0  ;;  %s1920_s30 = smov 0   ;;  %s1922_s10 = smov 0  }
   0x3   :  { %s1924_s11 = smov 0   ;;  %s1926_s12 = smov 0  }
   0x4 LB: > { %s1941_s13 = sadd.s32 4294967295, %s1864_s12   ;;  %s1176_s14 = sadd.s32 4294967294, %s1864_s12   ;;  %s1864_s12 = sphi %s1926_s12, %s2352_s12   ;;  %s1860_s11 = sphi %s1924_s11, %s2351_s11   ;;  %s1856_s10 = sphi %s1922_s10, %s2350_s10   ;;  %s1852_s30 = sphi %s1920_s30, %s2349_s30  }
   0x5   : > { %s1945_s15 = sadd.s32 1, %s1864_s12   ;;  %s224_s16 = sadd.s32 1, %s1860_s11 }
   0x6   : > { %s221_s17 = ssub.s32 %s1864_s12, %s1945_s15  ;;  %p234_p0 = scmp.ne.s32.totalorder %s1860_s11, %s1856_s10 }
   0x7   : > { %p222_p1 = scmp.eq.s32.totalorder %s221_s17, 0  ;;  %p235_p2 = scmp.eq.s32.totalorder %s1941_s13, 1 }
   0x8   : > { %p240_p3 = scmp.ne.s32.totalorder %s1856_s10, %s1852_s30  ;;  %p241_p4 = scmp.eq.s32.totalorder %s1176_s14, 1 }
   0x9   : > { %s1956_s18 = scalar_select %p222_p1, %s1860_s11, %s224_s16  }
   0xa   : > { %p1958_p5 = por %p235_p2, %p234_p0  ;;  %p1962_p6 = por %p241_p4, %p240_p3 }
   0xb   : > { %p1177_p7 = scmp.ge.s32.totalorder %s1864_s12, 1  ;;  %p248_p8 = scmp.lt.s32.totalorder %s1864_s12, 3 }
   0xc   : > { %p1741_p9 = scmp.eq.s32.totalorder %s1941_s13, 0  ;;  %s282_s24 = sshll.u32 %s2344_s8, 4  ;;  %s283_s24 = int_to_ptr.vmem [resolvable:$true] %s282_s24 }
   0xd   : > { %p1969_p10 = pnand %p1177_p7, %p248_p8  ;;  %s1783_s25 = scalar_lea.vmem %s283_s24, 16 }
   0xe   : > { %p1784_p13 = scmp.ne.s32.totalorder %s283_s24, %s1783_s25  ;;  %p1791_p3 = scmp.lt.s32.totalorder %s283_s24, %s283_s24 }
   0xf   : > { %p1733_p11 = pneg %p1969_p10  ;;  %p1792_p4 = scmp.lt.s32.totalorder %s1783_s25, %s1783_s25 }
  0x11   : > { %p1734_p12 = pnand %p1741_p9, %p1733_p11  ;;  %p1793_p7 = por %p1792_p4, %p1791_p3 }
  0x13   : > { %p1785_p0 = pneg %p1734_p12 }
  0x15   : > { %p1786_p1 = pnand %p1785_p0, %p1784_p13 }
  0x17   : > { %p1787_p2 = pneg %p1786_p1 }
  0x19   : > { %p1794_p8 = pnand %p1793_p7, %p1787_p2 }
  0x1b   : > { %1797 = shalt.err (!%p1794_p8)
}
  0x1c   : > { %s1866_s26 = smov [#allocation2]   ;;  %304 = sbr.rel (%p1969_p10) target bundleno = 1616 (0x650), region = 56 }
  0x1d   : > { %1736 = dma.vmem_to_smem (!%p1734_p12), %s283_s24, 16, %s1866_s26, [#allocation4]  }
  0x23   : > { %1843 = dma.done.wait (%p1741_p9), [#allocation4], 16  }
  0x24   : > { %1845 = vsyncadd (%p1741_p9), [#allocation4], 4294967280 }
  0x25   : > { %310 = sfence }
  0x26   : > { %v352_v0 = vld [vmem:[%s2337_s1] sm:$0xff]  ;;  %v353_v1 = vld [vmem:[%s2337_s1 + $0x8] sm:$0xff]  ;;  %v354_v2 = vld [vmem:[%s2337_s1 + $0x10] sm:$0xff]  ;;  %s1183_s21 = sshll.u32 %s1941_s13, 1  ;;  %s350_s14 = sld [smem:[#allocation2]]  ;;  %vm643_vm2 = vcmask 64512  }
  0x27   : > { %v1533_v3 = vpack.c.bf16 %v353_v1, %v352_v0  ;;  %v355_v4 = vld [vmem:[%s2337_s1 + $0x18] sm:$0xff]  ;;  %p342_p9 = scmp.lt.s32.totalorder %s1183_s21, 3  ;;  %v356_v6 = vld [vmem:[%s2337_s1 + $0x20] sm:$0xff]  ;;  %v357_v7 = vld [vmem:[%s2337_s1 + $0x28] sm:$0xff]  ;;  %s338_s17 = sand.u32 1, %s1856_s10   ;;  %vm1085_vm4 = vcmask 523264  }
  0x28   : > { %v1537_v5 = vpack.c.bf16 %v355_v4, %v354_v2  ;;  %v1541_v8 = vpack.c.bf16 %v357_v7, %v356_v6  ;;  %v358_v9 = vld [vmem:[%s2337_s1 + $0x30] sm:$0xff]  ;;  %v359_v10 = vld [vmem:[%s2337_s1 + $0x38] sm:$0xff]  ;;  %v360_v13 = vld [vmem:[%s2337_s1 + $0x40] sm:$0xff]  ;;  %s1185_s22 = sld [smem:[#allocation2 + $0x1]]  ;;  %s1182_s23 = sshll.u32 %s338_s17, 4 }
  0x29   : > { %1534 = vmatprep.subr.bf16.mxu1 %v1533_v3  ;;  %s2354_s21 = smov (!%p342_p9, %s1183_s21), 3  ;;  %v1545_v12 = vpack.c.bf16 %v359_v10, %v358_v9  ;;  %v361_v14 = vld [vmem:[%s2337_s1 + $0x48] sm:$0xff]  ;;  %v362_v16 = vld [vmem:[%s2337_s1 + $0x50] sm:$0xff]  ;;  %v363_v17 = vld [vmem:[%s2337_s1 + $0x58] sm:$0xff]  ;;  %s340_s26 = scalar_lea.vmem [#allocation5], %s1182_s23 }
  0x2a   : > { %1536 = vmatpush3.bf16.msra.mxu1 %v1533_v3  ;;  %s1184_s28 = sshll.u32 %s2354_s21, 3  ;;  %v1549_v15 = vpack.c.bf16 %v361_v14, %v360_v13  ;;  %v1553_v18 = vpack.c.bf16 %v363_v17, %v362_v16  ;;  %v364_v19 = vld [vmem:[%s2337_s1 + $0x60] sm:$0xff]  ;;  %v365_v20 = vld [vmem:[%s2337_s1 + $0x68] sm:$0xff]  ;;  %v366_v22 = vld [vmem:[%s2337_s1 + $0x70] sm:$0xff]  ;;  %s1102_s27 = sshll.u32 %s340_s26, 4  ;;  %s2293_s27 = int_to_ptr.vmem [resolvable:$true] %s1102_s27 }
  0x2b   : > { %1538 = vmatprep.subr.bf16.mxu1 %v1537_v5  ;;  %s2014_s24 = scalar_lea.vmem %s2336_s0, %s1184_s28  ;;  %v1557_v21 = vpack.c.bf16 %v365_v20, %v364_v19  ;;  %v367_v23 = vld [vmem:[%s2337_s1 + $0x78] sm:$0xff]  ;;  %v455_v25 = vld [vmem:[%s2338_s2] sm:$0xff]  ;;  %v456_v26 = vld [vmem:[%s2338_s2 + $0x8] sm:$0xff]  ;;  %s1198_s28 = sshll.u32 %s1941_s13, 8 }
  0x2c   : > { %v2017_v11 = vld [vmem:[%s2014_s24] sm:$0xff]  ;;  %v1561_v24 = vpack.c.bf16 %v367_v23, %v366_v22  ;;  %v1565_v27 = vpack.c.bf16 %v456_v26, %v455_v25  ;;  %v457_v28 = vld [vmem:[%s2338_s2 + $0x10] sm:$0xff]  ;;  %v458_v29 = vld [vmem:[%s2338_s2 + $0x18] sm:$0xff]  ;;  %v450_v9 = vstv %s350_s14  ;;  %s2291_s16 = scalar_lea.hbm %s2345_s9, %s1198_s28  ;;  %s2295_s13 = scalar_lea.sflag [#allocation3], %s338_s17 }
  0x2d   : > { %1345 = vmatprep.mubr.f32.mxu1 %v2017_v11  ;;  %v2057_v30 = vld [vmem:[%s2014_s24 + $0x8] sm:$0xff]  ;;  %v1569_v31 = vpack.c.bf16 %v458_v29, %v457_v28  ;;  %v459_v32 = vld [vmem:[%s2338_s2 + $0x20] sm:$0xff]  ;;  %v461_v35 = vld [vmem:[%s2338_s2 + $0x30] sm:$0xff]  ;;  %s1798_s24 = scalar_lea.vmem %s2293_s27, 256 }
  0x2e   : > { %1540 = vmatpush3.bf16.msra.mxu1 %v1537_v5  ;;  %v460_v33 = vld [vmem:[%s2338_s2 + $0x28] sm:$0xff]  ;;  %v462_v36 = vld [vmem:[%s2338_s2 + $0x38] sm:$0xff]  ;;  %v463_v38 = vld [vmem:[%s2338_s2 + $0x40] sm:$0xff]  ;;  %p1799_p10 = scmp.ne.s32.totalorder %s2293_s27, %s1798_s24 }
  0x2f   : > { %1542 = vmatprep.subr.bf16.mxu1 %v1541_v8  ;;  %v1573_v34 = vpack.c.bf16 %v460_v33, %v459_v32  ;;  %v1577_v37 = vpack.c.bf16 %v462_v36, %v461_v35  ;;  %v464_v39 = vld [vmem:[%s2338_s2 + $0x48] sm:$0xff]  ;;  %v465_v41 = vld [vmem:[%s2338_s2 + $0x50] sm:$0xff]  ;;  %v466_v42 = vld [vmem:[%s2338_s2 + $0x58] sm:$0xff] }
  0x30   : > { %v1581_v40 = vpack.c.bf16 %v464_v39, %v463_v38  ;;  %v1585_v43 = vpack.c.bf16 %v466_v42, %v465_v41  ;;  %v467_v44 = vld [vmem:[%s2338_s2 + $0x60] sm:$0xff]  ;;  %v468_v45 = vld [vmem:[%s2338_s2 + $0x68] sm:$0xff]  ;;  %v469_v47 = vld [vmem:[%s2338_s2 + $0x70] sm:$0xff]  ;;  %p1800_p11 = pnand %p1799_p10, %p1958_p5 }
  0x31   : > { %v1589_v46 = vpack.c.bf16 %v468_v45, %v467_v44  ;;  %v470_v48 = vld [vmem:[%s2338_s2 + $0x78] sm:$0xff]  ;;  %v551_v50 = vld [vmem:[%s2340_s4] sm:$0xff]  ;;  %v552_v51 = vld [vmem:[%s2340_s4 + $0x8] sm:$0xff] }
  0x32   : > { %1544 = vmatpush3.bf16.msra.mxu1 %v1541_v8  ;;  %v1593_v49 = vpack.c.bf16 %v470_v48, %v469_v47  ;;  %v553_v52 = vld [vmem:[%s2340_s4 + $0x10] sm:$0xff]  ;;  %v2105_v53 = vpack.c.bf16 %v552_v51, %v551_v50  ;;  %v554_v54 = vld [vmem:[%s2340_s4 + $0x18] sm:$0xff]  ;;  %v555_v56 = vld [vmem:[%s2340_s4 + $0x20] sm:$0xff]  ;;  %p1801_p12 = pneg %p1800_p11 }
  0x33   : > { %1546 = vmatprep.subr.bf16.mxu1 %v1545_v12  ;;  %v2110_v55 = vpack.c.bf16 %v554_v54, %v553_v52  ;;  %v556_v57 = vld [vmem:[%s2340_s4 + $0x28] sm:$0xff]  ;;  %v557_v59 = vld [vmem:[%s2340_s4 + $0x30] sm:$0xff]  ;;  %v558_v60 = vld [vmem:[%s2340_s4 + $0x38] sm:$0xff] }
  0x34   : > { %1598 = vmatprep.subr.bf16.mxu0 %v2105_v53  ;;  %v2121_v58 = vpack.c.bf16 %v556_v57, %v555_v56  ;;  %v1609_v61 = vpack.c.bf16 %v558_v60, %v557_v59  ;;  %v559_v62 = vld [vmem:[%s2340_s4 + $0x40] sm:$0xff]  ;;  %v560_v63 = vld [vmem:[%s2340_s4 + $0x48] sm:$0xff]  ;;  %v561_v1 = vld [vmem:[%s2340_s4 + $0x50] sm:$0xff] }
  0x35   : > { %1600 = vmatpush3.bf16.msra.mxu0 %v2105_v53  ;;  %v1613_v0 = vpack.c.bf16 %v560_v63, %v559_v62  ;;  %v562_v2 = vld [vmem:[%s2340_s4 + $0x58] sm:$0xff]  ;;  %v563_v4 = vld [vmem:[%s2340_s4 + $0x60] sm:$0xff]  ;;  %v564_v5 = vld [vmem:[%s2340_s4 + $0x68] sm:$0xff] }
  0x36   : > { %1548 = vmatpush3.bf16.msra.mxu1 %v1545_v12  ;;  %1602 = vmatprep.subr.bf16.mxu0 %v2110_v55  ;;  %v1617_v3 = vpack.c.bf16 %v562_v2, %v561_v1  ;;  %v1621_v6 = vpack.c.bf16 %v564_v5, %v563_v4  ;;  %v1186_v7 = vld [vmem:[%s2339_s3] ss:$0 sm:$0xff]  ;;  %v566_v19 = vld [vmem:[%s2340_s4 + $0x78] sm:$0xff]  ;;  %v1187_v22 = vld [vmem:[%s2339_s3 + $0x1] ss:$0 sm:$0xff] }
  0x37   : > { %1550 = vmatprep.subr.bf16.mxu1 %v1549_v15  ;;  %v905_v36 = vld [vmem:[%s2343_s7] sm:$0xff]  ;;  %v908_v44 = vld [vmem:[%s2343_s7 + $0x18] sm:$0xff]  ;;  %v911_v51 = vld [vmem:[%s2343_s7 + $0x30] sm:$0xff] }
  0x38   : > { %v909_v48 = vld [vmem:[%s2343_s7 + $0x20] sm:$0xff]  ;;  %v912_v52 = vld [vmem:[%s2343_s7 + $0x38] sm:$0xff]  ;;  %v915_v56 = vld [vmem:[%s2343_s7 + $0x50] sm:$0xff] }
  0x39   : > { %1604 = vmatpush3.bf16.msra.mxu0 %v2110_v55  ;;  %v913_v54 = vld [vmem:[%s2343_s7 + $0x40] sm:$0xff]  ;;  %v916_v57 = vld [vmem:[%s2343_s7 + $0x58] sm:$0xff]  ;;  %v918_v60 = vld [vmem:[%s2343_s7 + $0x68] sm:$0xff] }
  0x3a   : > { %1552 = vmatpush3.bf16.msra.mxu1 %v1549_v15  ;;  %1606 = vmatprep.subr.bf16.mxu0 %v2121_v58  ;;  %v917_v59 = vld [vmem:[%s2343_s7 + $0x60] sm:$0xff]  ;;  %v919_v62 = vld [vmem:[%s2343_s7 + $0x70] sm:$0xff]  ;;  %v920_v63 = vld [vmem:[%s2343_s7 + $0x78] sm:$0xff] }
  0x3b   : > { %1554 = vmatprep.subr.bf16.mxu1 %v1553_v18  ;;  %v889_v1 = vld [vmem:[%s2342_s6] sm:$0xff]  ;;  %v890_v2 = vld [vmem:[%s2342_s6 + $0x8] sm:$0xff]  ;;  %v891_v4 = vld [vmem:[%s2342_s6 + $0x10] sm:$0xff] }
  0x3c   : > { %v892_v5 = vld [vmem:[%s2342_s6 + $0x18] sm:$0xff] }
  0x3d   : > { %1608 = vmatpush3.bf16.msra.mxu0 %v2121_v58 }
  0x3e   : > { %1556 = vmatpush3.bf16.msra.mxu1 %v1553_v18  ;;  %1610 = vmatprep.subr.bf16.mxu0 %v1609_v61  ;;  %v565_v18 = vld [vmem:[%s2340_s4 + $0x70] sm:$0xff] }
  0x3f   : > { %1558 = vmatprep.subr.bf16.mxu1 %v1557_v21  ;;  %v1625_v20 = vpack.c.bf16 %v566_v19, %v565_v18  ;;  %v901_v19 = vld [vmem:[%s2342_s6 + $0x60] sm:$0xff] }
  0x41   : > { %1612 = vmatpush3.bf16.msra.mxu0 %v1609_v61 }
  0x42   : > { %1560 = vmatpush3.bf16.msra.mxu1 %v1557_v21  ;;  %1614 = vmatprep.subr.bf16.mxu0 %v1613_v0  ;;  %v642_v21 = vld [vmem:[%s2341_s5] sm:$0xff] }
  0x43   : > { %1562 = vmatprep.subr.bf16.mxu1 %v1561_v24 }
  0x45   : > { %1616 = vmatpush3.bf16.msra.mxu0 %v1613_v0 }
  0x46   : > { %1564 = vmatpush3.bf16.msra.mxu1 %v1561_v24  ;;  %1618 = vmatprep.subr.bf16.mxu0 %v1617_v3 }
  0x47   : > { %1566 = vmatprep.subr.bf16.mxu1 %v1565_v27 }
  0x49   : > { %1346 = vmatmul.mubr.f32.vlgmr.msra.gmra.mrb[0].mxu1 %v2057_v30  ;;  %1620 = vmatpush3.bf16.msra.mxu0 %v1617_v3 }
  0x4a   : > { %1568 = vmatpush3.bf16.msra.mxu1 %v1565_v27  ;;  %1622 = vmatprep.subr.bf16.mxu0 %v1621_v6 }
  0x4b   : > { %1570 = vmatprep.subr.bf16.mxu1 %v1569_v31 }
  0x4d   : > { %1624 = vmatpush3.bf16.msra.mxu0 %v1621_v6 }
  0x4e   : > { %1572 = vmatpush3.bf16.msra.mxu1 %v1569_v31  ;;  %1626 = vmatprep.subr.bf16.mxu0 %v1625_v20 }
  0x4f   : > { %1574 = vmatprep.subr.bf16.mxu1 %v1573_v34 }
  0x51   : > { %1628 = vmatpush3.bf16.msra.mxu0 %v1625_v20 }
  0x52   : > { %1576 = vmatpush3.bf16.msra.mxu1 %v1573_v34  ;;  %1458 = vmatprep.subr.mxu0 %v642_v21 }
  0x53   : > { %1578 = vmatprep.subr.bf16.mxu1 %v1577_v37 }
  0x56   : > { %1580 = vmatpush3.bf16.msra.mxu1 %v1577_v37  ;;  %v906_v37 = vld [vmem:[%s2343_s7 + $0x8] sm:$0xff] }
  0x57   : > { %1582 = vmatprep.subr.bf16.mxu1 %v1581_v40  ;;  %v1661_v38 = vpack.c.bf16 %v906_v37, %v905_v36 }
  0x5a   : > { %1584 = vmatpush3.bf16.msra.mxu1 %v1581_v40 }
  0x5b   : > { %1586 = vmatprep.subr.bf16.mxu1 %v1585_v43 }
  0x5e   : > { %1588 = vmatpush3.bf16.msra.mxu1 %v1585_v43  ;;  %v907_v43 = vld [vmem:[%s2343_s7 + $0x10] sm:$0xff] }
  0x5f   : > { %1590 = vmatprep.subr.bf16.mxu1 %v1589_v46 }
  0x62   : > { %1592 = vmatpush3.bf16.msra.mxu1 %v1589_v46  ;;  %v1665_v46 = vpack.c.bf16 %v908_v44, %v907_v43 }
  0x63   : > { %1594 = vmatprep.subr.bf16.mxu1 %v1593_v49 }
  0x66   : > { %1596 = vmatpush3.bf16.msra.mxu1 %v1593_v49  ;;  %v910_v49 = vld [vmem:[%s2343_s7 + $0x28] sm:$0xff] }
  0x67   : > { %1418 = vmatprep.subr.mxu1 %v642_v21  ;;  %v1669_v50 = vpack.c.bf16 %v910_v49, %v909_v48 }
 0x11c   : > { %v1347_v8 = vpop.f32.mrb[0].mxu1 }
 0x11d   : > { %v445_v10 = vadd.f32 %v1347_v8, %v1186_v7  ;;  %v439_v12 = vpop.f32.mrb[1].mxu1  ;;  %v894_v8 = vld [vmem:[%s2342_s6 + $0x28] sm:$0xff] }
 0x11e   : > { %v440_v13 = vadd.f32 %v1186_v7, %v439_v12  ;;  %v893_v7 = vld [vmem:[%s2342_s6 + $0x20] sm:$0xff]  ;;  %v896_v12 = vld [vmem:[%s2342_s6 + $0x38] sm:$0xff] }
 0x11f   : > { %v452_v14 = vmul.f32 %v450_v9, %v445_v10  ;;  %vm449_vm0 = vcmp.ge.f32.partialorder %v445_v10, 0.0 }
 0x120   : > { %v451_v15 = vmul.f32 %v450_v9, %v440_v13  ;;  %vm448_vm1 = vcmp.ge.f32.partialorder %v440_v13, 0.0  ;;  %v1701_v9 = vpack.c.bf16 %v894_v8, %v893_v7 }
 0x121   : > { %v454_v17 = vsel %vm449_vm0, %v445_v10, %v452_v14  ;;  %v895_v10 = vld [vmem:[%s2342_s6 + $0x30] sm:$0xff]  ;;  %v897_v14 = vld [vmem:[%s2342_s6 + $0x40] sm:$0xff] }
 0x122   : > { %v453_v16 = vsel %vm448_vm1, %v440_v13, %v451_v15  ;;  %v1705_v13 = vpack.c.bf16 %v896_v12, %v895_v10 }
 0x123   : > { %1380 = vmatprep.mubr.f32.mxu1 %v453_v16  ;;  %v899_v16 = vld [vmem:[%s2342_s6 + $0x50] sm:$0xff] }
 0x124   : > { %1381 = vmatmul.mubr.f32.vlgmr.msra.gmra.mrb[2].mxu1 %v454_v17  ;;  %v900_v17 = vld [vmem:[%s2342_s6 + $0x58] sm:$0xff] }
 0x125   : > { %1419 = vmatpush3.msra.mxu1 %v642_v21  ;;  %v1713_v18 = vpack.c.bf16 %v900_v17, %v899_v16 }
 0x126   : > { %1630 = vmatprep.subr.bf16.mxu1 %v2105_v53 }
 0x1f7   : > { %v1382_v23 = vpop.f32.mrb[2].mxu1 }
 0x1f8   : > { %v542_v24 = vpop.f32.mrb[3].mxu1  ;;  %v548_v26 = vadd.f32 %v1382_v23, %v1187_v22  ;;  %v904_v23 = vld [vmem:[%s2342_s6 + $0x78] sm:$0xff] }
 0x1f9   : > { %v543_v25 = vadd.f32 %v1187_v22, %v542_v24  ;;  %v903_v22 = vld [vmem:[%s2342_s6 + $0x70] sm:$0xff] }
 0x1fa   : > { %v1721_v24 = vpack.c.bf16 %v904_v23, %v903_v22 }
 0x1fb   : > { %1415 = vmatprep.mubr.f32.mxu0 %v543_v25 }
 0x1fc   : > { %1416 = vmatmul.mubr.f32.vlgmr.msra.gmra.mrb[0].mxu0 %v548_v26 }
 0x1fd   : > { %1459 = vmatpush3.msra.mxu0 %v642_v21 }
 0x1fe   : > { %1662 = vmatprep.subr.bf16.mxu0 %v1661_v38 }
 0x2cf   : > { %v1417_v27 = vpop.f32.mrb[0].mxu0 }
 0x2d0   : > { %v633_v28 = vpop.f32.mrb[1].mxu0 }
 0x2d1   : > { %1420 = vmatprep.mubr.msk.f32.mxu1 %vm643_vm2, %v633_v28 }
 0x2d2   : > { %1421 = vmatmul.mubr.msk.f32.vlgmr.msra.gmra.mrb[4].mxu1 %vm643_vm2, %v1417_v27 }
 0x2d3   : > { %1632 = vmatpush3.bf16.msra.mxu1 %v2105_v53  ;;  %v1673_v53 = vpack.c.bf16 %v912_v52, %v911_v51 }
 0x2d4   : > { %1634 = vmatprep.subr.bf16.mxu1 %v2110_v55 }
 0x2d7   : > { %1636 = vmatpush3.bf16.msra.mxu1 %v2110_v55 }
 0x2d8   : > { %1638 = vmatprep.subr.bf16.mxu1 %v2121_v58 }
 0x2db   : > { %1640 = vmatpush3.bf16.msra.mxu1 %v2121_v58  ;;  %v1681_v58 = vpack.c.bf16 %v916_v57, %v915_v56 }
 0x2dc   : > { %1642 = vmatprep.subr.bf16.mxu1 %v1609_v61 }
 0x2df   : > { %1644 = vmatpush3.bf16.msra.mxu1 %v1609_v61  ;;  %v1685_v61 = vpack.c.bf16 %v918_v60, %v917_v59 }
 0x2e0   : > { %1646 = vmatprep.subr.bf16.mxu1 %v1613_v0 }
 0x2e3   : > { %1648 = vmatpush3.bf16.msra.mxu1 %v1613_v0  ;;  %v1689_v0 = vpack.c.bf16 %v920_v63, %v919_v62 }
 0x2e4   : > { %1650 = vmatprep.subr.bf16.mxu1 %v1617_v3 }
 0x2e7   : > { %1652 = vmatpush3.bf16.msra.mxu1 %v1617_v3  ;;  %v1693_v3 = vpack.c.bf16 %v890_v2, %v889_v1 }
 0x2e8   : > { %1654 = vmatprep.subr.bf16.mxu1 %v1621_v6 }
 0x2eb   : > { %1656 = vmatpush3.bf16.msra.mxu1 %v1621_v6  ;;  %v1697_v6 = vpack.c.bf16 %v892_v5, %v891_v4 }
 0x2ec   : > { %1658 = vmatprep.subr.bf16.mxu1 %v1625_v20 }
 0x2ef   : > { %1660 = vmatpush3.bf16.msra.mxu1 %v1625_v20  ;;  %v902_v20 = vld [vmem:[%s2342_s6 + $0x68] sm:$0xff] }
 0x2f0   : > { %v1717_v21 = vpack.c.bf16 %v902_v20, %v901_v19 }
 0x3a5   : > { %v1422_v29 = vpop.f32.mrb[4].mxu1 }
 0x3a6   : > { %v2173_v31 = vsub.f32 %v548_v26, %v1422_v29  ;;  %v716_v32 = vpop.f32.mrb[5].mxu1  ;;  %v1192_v29 = vld [vmem:[%s2339_s3 + $0x2] ss:$0 sm:$0xff] }
 0x3a7   : > { %v2175_v33 = vsub.f32 %v543_v25, %v716_v32 }
 0x3a8   : > { %v728_v35 = vmul.f32 %v2173_v31, %v2173_v31 }
 0x3a9   : > { %v727_v34 = vmul.f32 %v2175_v33, %v2175_v33 }
 0x3ab   : > { %1455 = vmatprep.mubr.f32.mxu1 %v727_v34  ;;  %v1080_v34 = vstv %s1185_s22  ;;  %s1867_s22 = smov [#allocation5]  }
 0x3ac   : > { %1456 = vmatmul.mubr.f32.vlgmr.msra.gmra.mrb[6].mxu1 %v728_v35  ;;  %s1802_s23 = sshll.u32 %s1867_s22, 4  ;;  %s1803_s23 = int_to_ptr.vmem [resolvable:$false] %s1802_s23 }
 0x3ad   : > { %s1804_s21 = scalar_lea.vmem %s1803_s23, 512  ;;  %p1805_p13 = scmp.lt.s32.totalorder %s2293_s27, %s1803_s23 }
 0x3ae   : > { %p1806_p0 = scmp.lt.s32.totalorder %s1804_s21, %s1798_s24 }
 0x3b0   : > { %p1807_p1 = por %p1806_p0, %p1805_p13 }
 0x3b2   : > { %p1808_p2 = pnand %p1807_p1, %p1801_p12 }
 0x47f   : > { %v1457_v39 = vpop.f32.mrb[6].mxu1 }
 0x480   : > { %v801_v40 = vadd.f32 1e-05, %v1457_v39  ;;  %v795_v41 = vpop.f32.mrb[7].mxu1 }
 0x481   : > { %v796_v42 = vadd.f32 1e-05, %v795_v41 }
 0x483   : > { %1779 = vrsqrt.f32 %v796_v42 }
 0x484   : > { %1781 = vrsqrt.f32 %v801_v40 }
 0x48d   : > { %v1780_v45 = vpop.eup %1779 }
 0x48e   : > { %v1782_v47 = vpop.eup %1781  ;;  %1460 = vmatprep.mubr.msk.f32.mxu0 %vm643_vm2, %v1780_v45 }
 0x48f   : > { %1461 = vmatmul.mubr.msk.f32.vlgmr.msra.gmra.mrb[2].mxu0 %vm643_vm2, %v1782_v47 }
 0x490   : > { %1664 = vmatpush3.bf16.msra.mxu0 %v1661_v38  ;;  %1495 = vmatprep.mubr.f32.mxu0 %v2017_v11  ;;  %v914_v11 = vld [vmem:[%s2343_s7 + $0x48] sm:$0xff] }
 0x491   : > { %1666 = vmatprep.subr.bf16.mxu0 %v1665_v46  ;;  %v1677_v55 = vpack.c.bf16 %v914_v11, %v913_v54 }
 0x494   : > { %1668 = vmatpush3.bf16.msra.mxu0 %v1665_v46 }
 0x495   : > { %1670 = vmatprep.subr.bf16.mxu0 %v1669_v50 }
 0x498   : > { %1672 = vmatpush3.bf16.msra.mxu0 %v1669_v50 }
 0x499   : > { %1674 = vmatprep.subr.bf16.mxu0 %v1673_v53 }
 0x49c   : > { %1676 = vmatpush3.bf16.msra.mxu0 %v1673_v53 }
 0x49d   : > { %1678 = vmatprep.subr.bf16.mxu0 %v1677_v55 }
 0x4a0   : > { %1680 = vmatpush3.bf16.msra.mxu0 %v1677_v55 }
 0x4a1   : > { %1682 = vmatprep.subr.bf16.mxu0 %v1681_v58 }
 0x4a4   : > { %1684 = vmatpush3.bf16.msra.mxu0 %v1681_v58 }
 0x4a5   : > { %1686 = vmatprep.subr.bf16.mxu0 %v1685_v61 }
 0x4a8   : > { %1688 = vmatpush3.bf16.msra.mxu0 %v1685_v61 }
 0x4a9   : > { %1690 = vmatprep.subr.bf16.mxu0 %v1689_v0 }
 0x4ac   : > { %1692 = vmatpush3.bf16.msra.mxu0 %v1689_v0 }
 0x4ad   : > { %1694 = vmatprep.subr.bf16.mxu0 %v1693_v3 }
 0x4af   : > { %1496 = vmatmul.mubr.f32.vlgmr.msra.gmra.mrb[4].mxu0 %v2057_v30  ;;  %v898_v30 = vld [vmem:[%s2342_s6 + $0x48] sm:$0xff] }
 0x4b0   : > { %1696 = vmatpush3.bf16.msra.mxu0 %v1693_v3  ;;  %v1709_v15 = vpack.c.bf16 %v898_v30, %v897_v14 }
 0x4b1   : > { %1698 = vmatprep.subr.bf16.mxu0 %v1697_v6 }
 0x4b4   : > { %1700 = vmatpush3.bf16.msra.mxu0 %v1697_v6 }
 0x4b5   : > { %1702 = vmatprep.subr.bf16.mxu0 %v1701_v9 }
 0x4b8   : > { %1704 = vmatpush3.bf16.msra.mxu0 %v1701_v9 }
 0x4b9   : > { %1706 = vmatprep.subr.bf16.mxu0 %v1705_v13 }
 0x4bc   : > { %1708 = vmatpush3.bf16.msra.mxu0 %v1705_v13 }
 0x4bd   : > { %1710 = vmatprep.subr.bf16.mxu0 %v1709_v15 }
 0x4c0   : > { %1712 = vmatpush3.bf16.msra.mxu0 %v1709_v15 }
 0x4c1   : > { %1714 = vmatprep.subr.bf16.mxu0 %v1713_v18 }
 0x4c4   : > { %1716 = vmatpush3.bf16.msra.mxu0 %v1713_v18 }
 0x4c5   : > { %1718 = vmatprep.subr.bf16.mxu0 %v1717_v21 }
 0x4c8   : > { %1720 = vmatpush3.bf16.msra.mxu0 %v1717_v21 }
 0x4c9   : > { %1722 = vmatprep.subr.bf16.mxu0 %v1721_v24 }
 0x4cc   : > { %1724 = vmatpush3.bf16.msra.mxu0 %v1721_v24 }
 0x562   : > { %v1462_v25 = vpop.f32.mrb[2].mxu0 }
 0x563   : > { %v878_v26 = vpop.f32.mrb[3].mxu0  ;;  %v888_v28 = vmul.f32 %v1462_v25, %v2173_v31 }
 0x564   : > { %v887_v27 = vmul.f32 %v878_v26, %v2175_v33 }
 0x566   : > { %1530 = vmatprep.mubr.f32.mxu0 %v887_v27 }
 0x567   : > { %1531 = vmatmul.mubr.f32.vlgmr.msra.gmra.mrb[4].mxu0 %v888_v28 }
 0x63a   : > { %v1532_v32 = vpop.f32.mrb[4].mxu0 }
 0x63b   : > { %v1077_v35 = vadd.f32 %v1532_v32, %v1192_v29  ;;  %v1062_v36 = vpop.f32.mrb[5].mxu0 }
 0x63c   : > { %v1076_v33 = vadd.f32 %v1192_v29, %v1062_v36 }
 0x63d   : > { %vm1079_vm3 = vcmp.ge.f32.partialorder %v1077_v35, 0.0  ;;  %v1082_v31 = vmul.f32 %v1080_v34, %v1077_v35 }
 0x63e   : > { %vm1078_vm5 = vcmp.ge.f32.partialorder %v1076_v33, 0.0  ;;  %v1081_v37 = vmul.f32 %v1080_v34, %v1076_v33 }
 0x63f   : > { %v1084_v38 = vsel %vm1079_vm3, %v1077_v35, %v1082_v31 }
 0x640   : > { %1087 = vst.msk [vmem:[%s340_s26 + $0x8] sm:$0xff] %vm1085_vm4, %v1084_v38  ;;  %v1083_v39 = vsel %vm1078_vm5, %v1076_v33, %v1081_v37 }
 0x641   : > { %1086 = vst.msk [vmem:[%s340_s26] sm:$0xff] %vm1085_vm4, %v1083_v39 }
 0x642   : > { %1811 = shalt.err (!%p1808_p2)
}
 0x643   : > { %s1812_s17 = scalar_lea.hbm %s2291_s16, 256  ;;  %s1816_s28 = scalar_lea.hbm %s2345_s9, 512 }
 0x644   : > { %p1813_p3 = scmp.ne.s32.totalorder %s2291_s16, %s1812_s17  ;;  %p1817_p8 = scmp.lt.u32.totalorder %s2291_s16, %s2345_s9 }
 0x645   : > { %p1818_p9 = scmp.lt.u32.totalorder %s1816_s28, %s1812_s17  ;;  %p1820_p11 = scmp.lt.u32.totalorder %s1812_s17, %s2291_s16 }
 0x646   : > { %p1814_p4 = pnand %p1813_p3, %p1958_p5 }
 0x647   : > { %p1819_p10 = por %p1818_p9, %p1817_p8 }
 0x648   : > { %p1815_p7 = pneg %p1814_p4 }
 0x649   : > { %p1821_p12 = por %p1820_p11, %p1819_p10 }
 0x64b   : > { %p1822_p13 = pnand %p1821_p12, %p1815_p7 }
 0x64d   : > { %1825 = shalt.err (!%p1822_p13)
}
 0x64e   : > { %s1868_s24 = smov 128   ;;  %s1869_s22 = smov 8  }
 0x64f   : > { %1731 = dma.vmem_to_hbm [thread:$0]  (%p1958_p5), %s2293_s27, 256, %s2291_s16, %s2295_s13, %s1868_s24, %s1868_s24, %s1869_s22  }
 0x650 PF: > { %p1743_p0 = scmp.ge.s32.totalorder %s1864_s12, 2  ;;  %s1117_s23 = sand.u32 1, %s1852_s30  }
 0x651   : > { %s1118_s21 = scalar_lea.sflag [#allocation3], %s1117_s23 }
 0x652   : > { %p1738_p1 = pnand %p1743_p0, %p1962_p6 }
 0x654   : > { %1847 = dma.done.wait (!%p1738_p1), %s1118_s21, 256  }
 0x655   : > { %1849 = vsyncadd (!%p1738_p1), %s1118_s21, 4294967040  ;;  %p20_p2 = scmp.ge.s32.totalorder %s1945_s15, 4   ;;  %s2349_s30 = smov %s1856_s10 }
 0x656   : > { %s2350_s10 = smov %s1860_s11  ;;  %s2351_s11 = smov %s1956_s18 }
 0x657   : > { %s2352_s12 = smov %s1945_s15  ;;  %22 = sbr.rel (!%p20_p2) target bundleno = 4 (0x4), region = 96 }
 0x65e   :  { %1123 = vsyncpa [#allocation3], 1 }
 0x65f   :  { %1125 = vsyncpa [#allocation3 + $0x1], 1 }
 0x660   :  { %1126 = vsyncpa [#allocation4], 1 }
 0x661   :  { %1128 = vsyncpa [#allocation4 + $0x1], 1 }

</bundles_post_ra>
